<compile_context>
chip_gen: v5e
topology: v5e:2x2
jax: 0.10.0
libtpu: 0.0.40
codegen_flags: <defaults>
</compile_context>

<pallas_src>
import functools

import jax
import jax.numpy as jnp
from jax.experimental import pallas as pl
from jax.experimental.pallas import tpu as pltpu


def _dnn_kernel(x_ref, w1_ref, b1_ref, w2_ref, b2_ref,
                w3_ref, b3_ref, w4_ref, b4_ref, out_ref):
    x = x_ref[...]

    # mlp1: Linear(56->64), Dropout(p=0.2) -> identity (eval), ReLU
    h1 = jnp.dot(x, w1_ref[...], preferred_element_type=jnp.float32) + b1_ref[...]
    h1 = jnp.maximum(h1, 0.0)

    # mlp2: Linear(64->32), Dropout(p=0.1) -> identity (eval), Sigmoid
    h2 = jax.nn.sigmoid(
        jnp.dot(h1, w2_ref[...], preferred_element_type=jnp.float32) + b2_ref[...])

    # mlp3_1: Linear(32->16), Sigmoid
    h3 = jax.nn.sigmoid(
        jnp.dot(h2, w3_ref[...], preferred_element_type=jnp.float32) + b3_ref[...])

    # mlp3_2: Linear(16->2), Sigmoid.  The 2-wide store is a masked vst but
    # writes only the real 8 B/row payload instead of a 512 B/row padded slab.
    y = jax.nn.sigmoid(
        jnp.dot(h3, w4_ref[...], preferred_element_type=jnp.float32) + b4_ref[...])

    out_ref[...] = y.astype(out_ref.dtype)


def _round_up(n, m):
    return ((n + m - 1) // m) * m


def _choose_tile(batch, tile_b):
    """Batch tile: multiple of 8, <= tile_b, and (when the batch is large
    enough) small enough for >= 2 grid steps so v7x megacore gets work."""
    tile_b = max(8, (int(tile_b) // 8) * 8)          # enforce 8-row alignment
    b8 = _round_up(batch, 8)
    two_step = _round_up(-(-batch // 2), 16) if batch >= 32 else b8
    return max(8, min(tile_b, b8, two_step))


@functools.partial(jax.jit, static_argnames=("tile_b",))
def dnn_forward(x, params, *, tile_b=8192):
    """x: [B, 56] float32. params: W1..W4 as [in, out], b1..b4 as [1, out]."""
    B, F = x.shape
    assert F == 56, f"expected 56 input features, got {F}"

    tile = _choose_tile(B, tile_b)
    b_pad = _round_up(B, tile)
    grid = (b_pad // tile,)

    # x goes in raw (f32; 56 == full last dim, so no feature pad / cast pass).
    xp = x if b_pad == B else jnp.pad(x, ((0, b_pad - B), (0, 0)))

    w1 = params["W1"].astype(jnp.float32)   # (56, 64)
    w2 = params["W2"].astype(jnp.float32)   # (64, 32)
    w3 = params["W3"].astype(jnp.float32)   # (32, 16)
    w4 = params["W4"].astype(jnp.float32)   # (16, 2)
    b1 = params["b1"].astype(jnp.float32)   # (1, 64)
    b2 = params["b2"].astype(jnp.float32)   # (1, 32)
    b3 = params["b3"].astype(jnp.float32)   # (1, 16)
    b4 = params["b4"].astype(jnp.float32)   # (1, 2)

    def _x_map(i):
        return (i, 0)

    def _const_map(i):
        return (0, 0)

    in_specs = [
        pl.BlockSpec((tile, 56), _x_map),      # x tile (pipelined over batch)
        pl.BlockSpec((56, 64), _const_map),    # W1
        pl.BlockSpec((1, 64), _const_map),     # b1
        pl.BlockSpec((64, 32), _const_map),    # W2
        pl.BlockSpec((1, 32), _const_map),     # b2
        pl.BlockSpec((32, 16), _const_map),    # W3
        pl.BlockSpec((1, 16), _const_map),     # b3
        pl.BlockSpec((16, 2), _const_map),     # W4
        pl.BlockSpec((1, 2), _const_map),      # b4
    ]
    out_spec = pl.BlockSpec((tile, 2), _x_map)

    out = pl.pallas_call(
        _dnn_kernel,
        out_shape=jax.ShapeDtypeStruct((b_pad, 2), jnp.float32),
        grid=grid,
        in_specs=in_specs,
        out_specs=out_spec,
        compiler_params=pltpu.CompilerParams(
            dimension_semantics=("parallel",)),
    )(xp, w1, b1, w2, b2, w3, b3, w4, b4)

    return out if b_pad == B else out[:B]


def init_params(key):
    """torch.nn.Linear-style init; weights stored transposed as [in, out]."""
    dims = [(56, 64), (64, 32), (32, 16), (16, 2)]
    params = {}
    for i, (fan_in, fan_out) in enumerate(dims, start=1):
        key, kw, kb = jax.random.split(key, 3)
        bound = 1.0 / jnp.sqrt(float(fan_in))
        params[f"W{i}"] = jax.random.uniform(
            kw, (fan_in, fan_out), jnp.float32, minval=-bound, maxval=bound)
        params[f"b{i}"] = jax.random.uniform(
            kb, (1, fan_out), jnp.float32, minval=-bound, maxval=bound)
    return params


def reference_forward(x, params):
    """Pure-JAX f32 reference with identical math."""
    h1 = jnp.maximum(x @ params["W1"] + params["b1"], 0.0)
    h2 = jax.nn.sigmoid(h1 @ params["W2"] + params["b2"])
    h3 = jax.nn.sigmoid(h2 @ params["W3"] + params["b3"])
    return jax.nn.sigmoid(h3 @ params["W4"] + params["b4"])


if __name__ == "__main__":
    key = jax.random.PRNGKey(0)
    kx, kp = jax.random.split(key)
    params = init_params(kp)

    # Small batch: single-step grid path.
    B = 8
    x = jax.random.normal(kx, (B, 56), dtype=jnp.float32)
    out = jax.block_until_ready(dnn_forward(x, params))
    ref = reference_forward(x, params)
    assert out.shape == (B, 2)
    assert float(jnp.max(jnp.abs(out - ref))) < 1e-2

    # Larger, non-tile-multiple batch: exercises the batch grid, pipelining,
    # the batch-row padding and the trailing [:B] slice.
    B2 = 1000
    x2 = jax.random.normal(jax.random.PRNGKey(1), (B2, 56), dtype=jnp.float32)
    out2 = jax.block_until_ready(dnn_forward(x2, params, tile_b=256))
    ref2 = reference_forward(x2, params)
    assert out2.shape == (B2, 2)
    assert float(jnp.max(jnp.abs(out2 - ref2))) < 1e-2

    print("KERNEL_OK")
</pallas_src>

<mosaic_0001>
module attributes {stable_mosaic.version = 11 : i64} {
  func.func @_dnn_kernel(%arg0: i32, %arg1: memref<8x56xf32, #tpu.memory_space<vmem>>, %arg2: memref<56x64xf32, #tpu.memory_space<vmem>>, %arg3: memref<1x64xf32, #tpu.memory_space<vmem>>, %arg4: memref<64x32xf32, #tpu.memory_space<vmem>>, %arg5: memref<1x32xf32, #tpu.memory_space<vmem>>, %arg6: memref<32x16xf32, #tpu.memory_space<vmem>>, %arg7: memref<1x16xf32, #tpu.memory_space<vmem>>, %arg8: memref<16x2xf32, #tpu.memory_space<vmem>>, %arg9: memref<1x2xf32, #tpu.memory_space<vmem>>, %arg10: memref<8x2xf32, #tpu.memory_space<vmem>>) attributes {dimension_semantics = [#tpu.dimension_semantics<parallel>], iteration_bounds = array<i64: 1>, scalar_prefetch = 0 : i64, scratch_operands = 0 : i64, tpu.core_type = #tpu.core_type<tc>, window_params = [{transform_indices = @transform_0, window_bounds = array<i64: 8, 56>}, {pipeline_mode = #tpu.pipeline_mode<synchronous>, transform_indices = @transform_1, window_bounds = array<i64: 56, 64>}, {pipeline_mode = #tpu.pipeline_mode<synchronous>, transform_indices = @transform_2, window_bounds = array<i64: 1, 64>}, {pipeline_mode = #tpu.pipeline_mode<synchronous>, transform_indices = @transform_3, window_bounds = array<i64: 64, 32>}, {pipeline_mode = #tpu.pipeline_mode<synchronous>, transform_indices = @transform_4, window_bounds = array<i64: 1, 32>}, {pipeline_mode = #tpu.pipeline_mode<synchronous>, transform_indices = @transform_5, window_bounds = array<i64: 32, 16>}, {pipeline_mode = #tpu.pipeline_mode<synchronous>, transform_indices = @transform_6, window_bounds = array<i64: 1, 16>}, {pipeline_mode = #tpu.pipeline_mode<synchronous>, transform_indices = @transform_7, window_bounds = array<i64: 16, 2>}, {pipeline_mode = #tpu.pipeline_mode<synchronous>, transform_indices = @transform_8, window_bounds = array<i64: 1, 2>}, {transform_indices = @transform_9, window_bounds = array<i64: 8, 2>}]} {
    %c0 = arith.constant 0 : index
    %c0_0 = arith.constant 0 : index
    %0 = vector.load %arg1[%c0, %c0_0] : memref<8x56xf32, #tpu.memory_space<vmem>>, vector<8x56xf32>
    %c0_1 = arith.constant 0 : index
    %c0_2 = arith.constant 0 : index
    %1 = vector.load %arg2[%c0_1, %c0_2] : memref<56x64xf32, #tpu.memory_space<vmem>>, vector<56x64xf32>
    %cst = arith.constant dense<0.000000e+00> : vector<8x64xf32>
    %2 = tpu.matmul %0, %1, %cst {dimension_numbers = #tpu.dot_dimension_numbers<[1], [0], [0], [1], [0, 0, 1, 1], [], []>} : vector<8x56xf32>, vector<56x64xf32>, vector<8x64xf32> -> vector<8x64xf32>
    %c0_3 = arith.constant 0 : index
    %c0_4 = arith.constant 0 : index
    %3 = vector.load %arg3[%c0_3, %c0_4] : memref<1x64xf32, #tpu.memory_space<vmem>>, vector<1x64xf32>
    %4 = vector.broadcast %3 : vector<1x64xf32> to vector<8x64xf32>
    %5 = arith.addf %2, %4 : vector<8x64xf32>
    %cst_5 = arith.constant 0.000000e+00 : f32
    %6 = vector.broadcast %cst_5 : f32 to vector<8x64xf32>
    %7 = arith.maximumf %5, %6 : vector<8x64xf32>
    %c0_6 = arith.constant 0 : index
    %c0_7 = arith.constant 0 : index
    %8 = vector.load %arg4[%c0_6, %c0_7] : memref<64x32xf32, #tpu.memory_space<vmem>>, vector<64x32xf32>
    %cst_8 = arith.constant dense<0.000000e+00> : vector<8x32xf32>
    %9 = tpu.matmul %7, %8, %cst_8 {dimension_numbers = #tpu.dot_dimension_numbers<[1], [0], [0], [1], [0, 0, 1, 1], [], []>} : vector<8x64xf32>, vector<64x32xf32>, vector<8x32xf32> -> vector<8x32xf32>
    %c0_9 = arith.constant 0 : index
    %c0_10 = arith.constant 0 : index
    %10 = vector.load %arg5[%c0_9, %c0_10] : memref<1x32xf32, #tpu.memory_space<vmem>>, vector<1x32xf32>
    %11 = vector.broadcast %10 : vector<1x32xf32> to vector<8x32xf32>
    %12 = arith.addf %9, %11 : vector<8x32xf32>
    %13 = arith.negf %12 : vector<8x32xf32>
    %14 = math.exp %13 : vector<8x32xf32>
    %cst_11 = arith.constant 1.000000e+00 : f32
    %15 = vector.broadcast %cst_11 : f32 to vector<8x32xf32>
    %16 = arith.addf %15, %14 : vector<8x32xf32>
    %17 = arith.divf %15, %16 : vector<8x32xf32>
    %c0_12 = arith.constant 0 : index
    %c0_13 = arith.constant 0 : index
    %18 = vector.load %arg6[%c0_12, %c0_13] : memref<32x16xf32, #tpu.memory_space<vmem>>, vector<32x16xf32>
    %cst_14 = arith.constant dense<0.000000e+00> : vector<8x16xf32>
    %19 = tpu.matmul %17, %18, %cst_14 {dimension_numbers = #tpu.dot_dimension_numbers<[1], [0], [0], [1], [0, 0, 1, 1], [], []>} : vector<8x32xf32>, vector<32x16xf32>, vector<8x16xf32> -> vector<8x16xf32>
    %c0_15 = arith.constant 0 : index
    %c0_16 = arith.constant 0 : index
    %20 = vector.load %arg7[%c0_15, %c0_16] : memref<1x16xf32, #tpu.memory_space<vmem>>, vector<1x16xf32>
    %21 = vector.broadcast %20 : vector<1x16xf32> to vector<8x16xf32>
    %22 = arith.addf %19, %21 : vector<8x16xf32>
    %23 = arith.negf %22 : vector<8x16xf32>
    %24 = math.exp %23 : vector<8x16xf32>
    %cst_17 = arith.constant 1.000000e+00 : f32
    %25 = vector.broadcast %cst_17 : f32 to vector<8x16xf32>
    %26 = arith.addf %25, %24 : vector<8x16xf32>
    %27 = arith.divf %25, %26 : vector<8x16xf32>
    %c0_18 = arith.constant 0 : index
    %c0_19 = arith.constant 0 : index
    %28 = vector.load %arg8[%c0_18, %c0_19] : memref<16x2xf32, #tpu.memory_space<vmem>>, vector<16x2xf32>
    %cst_20 = arith.constant dense<0.000000e+00> : vector<8x2xf32>
    %29 = tpu.matmul %27, %28, %cst_20 {dimension_numbers = #tpu.dot_dimension_numbers<[1], [0], [0], [1], [0, 0, 1, 1], [], []>} : vector<8x16xf32>, vector<16x2xf32>, vector<8x2xf32> -> vector<8x2xf32>
    %c0_21 = arith.constant 0 : index
    %c0_22 = arith.constant 0 : index
    %30 = vector.load %arg9[%c0_21, %c0_22] : memref<1x2xf32, #tpu.memory_space<vmem>>, vector<1x2xf32>
    %31 = vector.broadcast %30 : vector<1x2xf32> to vector<8x2xf32>
    %32 = arith.addf %29, %31 : vector<8x2xf32>
    %33 = arith.negf %32 : vector<8x2xf32>
    %34 = math.exp %33 : vector<8x2xf32>
    %cst_23 = arith.constant 1.000000e+00 : f32
    %35 = vector.broadcast %cst_23 : f32 to vector<8x2xf32>
    %36 = arith.addf %35, %34 : vector<8x2xf32>
    %37 = arith.divf %35, %36 : vector<8x2xf32>
    %c0_24 = arith.constant 0 : index
    %c0_25 = arith.constant 0 : index
    %38 = vector.load %arg10[%c0_24, %c0_25] : memref<8x2xf32, #tpu.memory_space<vmem>>, vector<8x2xf32>
    tpu.vector_store %arg10[%c0_24, %c0_25], %37 {strides = array<i32>} : memref<8x2xf32, #tpu.memory_space<vmem>>, vector<8x2xf32>,
    return
  }
  func.func @transform_0(%arg0: i32) -> (i32, i32) {
    %c0_i32 = arith.constant 0 : i32
    %c0_i32_0 = arith.constant 0 : i32
    return %arg0, %c0_i32 : i32, i32
  }
  func.func @transform_1(%arg0: i32) -> (i32, i32) {
    %c0_i32 = arith.constant 0 : i32
    %c0_i32_0 = arith.constant 0 : i32
    %c0_i32_1 = arith.constant 0 : i32
    return %c0_i32, %c0_i32_0 : i32, i32
  }
  func.func @transform_2(%arg0: i32) -> (i32, i32) {
    %c0_i32 = arith.constant 0 : i32
    %c0_i32_0 = arith.constant 0 : i32
    %c0_i32_1 = arith.constant 0 : i32
    return %c0_i32, %c0_i32_0 : i32, i32
  }
  func.func @transform_3(%arg0: i32) -> (i32, i32) {
    %c0_i32 = arith.constant 0 : i32
    %c0_i32_0 = arith.constant 0 : i32
    %c0_i32_1 = arith.constant 0 : i32
    return %c0_i32, %c0_i32_0 : i32, i32
  }
  func.func @transform_4(%arg0: i32) -> (i32, i32) {
    %c0_i32 = arith.constant 0 : i32
    %c0_i32_0 = arith.constant 0 : i32
    %c0_i32_1 = arith.constant 0 : i32
    return %c0_i32, %c0_i32_0 : i32, i32
  }
  func.func @transform_5(%arg0: i32) -> (i32, i32) {
    %c0_i32 = arith.constant 0 : i32
    %c0_i32_0 = arith.constant 0 : i32
    %c0_i32_1 = arith.constant 0 : i32
    return %c0_i32, %c0_i32_0 : i32, i32
  }
  func.func @transform_6(%arg0: i32) -> (i32, i32) {
    %c0_i32 = arith.constant 0 : i32
    %c0_i32_0 = arith.constant 0 : i32
    %c0_i32_1 = arith.constant 0 : i32
    return %c0_i32, %c0_i32_0 : i32, i32
  }
  func.func @transform_7(%arg0: i32) -> (i32, i32) {
    %c0_i32 = arith.constant 0 : i32
    %c0_i32_0 = arith.constant 0 : i32
    %c0_i32_1 = arith.constant 0 : i32
    return %c0_i32, %c0_i32_0 : i32, i32
  }
  func.func @transform_8(%arg0: i32) -> (i32, i32) {
    %c0_i32 = arith.constant 0 : i32
    %c0_i32_0 = arith.constant 0 : i32
    %c0_i32_1 = arith.constant 0 : i32
    return %c0_i32, %c0_i32_0 : i32, i32
  }
  func.func @transform_9(%arg0: i32) -> (i32, i32) {
    %c0_i32 = arith.constant 0 : i32
    %c0_i32_0 = arith.constant 0 : i32
    return %arg0, %c0_i32 : i32, i32
  }
}

</mosaic_0001>

<bundles_post_ra>
// kernel: dnn_forward.1
= control target key start
LH: loop header
LB: loop body
LE: loop exit
PB: predicated region body
PF: predicated region fallthrough
CT: control target
= control target key end

     0   :  { %vm44_vm0 = vcmask 457728   ;;  %vm81_vm1 = vcmask 523264   ;;  %vm132_vm5 = vcmask 261120   ;;  %vm181_vm10 = vcmask 130048   ;;  %s384_s1 = inlined_call_operand.vmem [shape: f32[56,64], index: 1, kind: input, shape index: {}]   ;;  %s385_s3 = inlined_call_operand.vmem [shape: f32[64,32], index: 3, kind: input, shape index: {}]   ;;  %s386_s2 = inlined_call_operand.vmem [shape: f32[1,64], index: 2, kind: input, shape index: {}]   ;;  %s387_s0 = inlined_call_operand.vmem [shape: f32[8,56], index: 0, kind: input, shape index: {}]   ;;  %s388_s4 = inlined_call_operand.vmem [shape: f32[1,32], index: 4, kind: input, shape index: {}]   ;;  %s389_s6 = inlined_call_operand.vmem [shape: f32[1,16], index: 6, kind: input, shape index: {}]   ;;  %s390_s5 = inlined_call_operand.vmem [shape: f32[32,16], index: 5, kind: input, shape index: {}]   ;;  %s391_s8 = inlined_call_operand.vmem [shape: f32[1,2], index: 8, kind: input, shape index: {}]   ;;  %s392_s7 = inlined_call_operand.vmem [shape: f32[16,2], index: 7, kind: input, shape index: {}]   ;;  %s393_s9 = inlined_call_operand.vmem [shape: f32[8,2], index: 9, kind: output, shape index: {}]  }
   0x1   :  { %v39_v0 = vld [vmem:[%s384_s1 + $0x30] sm:$0xff]  ;;  %v38_v1 = vld [vmem:[%s384_s1 + $0x28] sm:$0xff]  ;;  %v37_v2 = vld [vmem:[%s384_s1 + $0x20] sm:$0xff]  ;;  %vm224_vm15 = vcmask 15360  }
   0x2   :  { %57 = vmatpush.msra.mxu0 %v39_v0  ;;  %v76_v3 = vld [vmem:[%s385_s3 + $0x38] sm:$0xff]  ;;  %v75_v4 = vld [vmem:[%s385_s3 + $0x30] sm:$0xff]  ;;  %v74_v6 = vld [vmem:[%s385_s3 + $0x28] sm:$0xff] }
   0x3   :  { %93 = vmatpush.msra.mxu1 %v76_v3  ;;  %v36_v5 = vld [vmem:[%s384_s1 + $0x18] sm:$0xff]  ;;  %v35_v7 = vld [vmem:[%s384_s1 + $0x10] sm:$0xff]  ;;  %v73_v8 = vld [vmem:[%s385_s3 + $0x20] sm:$0xff] }
   0x4   :  { %58 = vmatpush.msra.mxu0 %v38_v1  ;;  %v34_v9 = vld [vmem:[%s384_s1 + $0x8] sm:$0xff]  ;;  %v72_v10 = vld [vmem:[%s385_s3 + $0x18] sm:$0xff]  ;;  %v33_v11 = vld [vmem:[%s384_s1] sm:$0xff] }
   0x5   :  { %94 = vmatpush.msra.mxu1 %v75_v4  ;;  %v32_v12 = vld [vmem:[%s387_s0] sm:$0xff]  ;;  %v71_v13 = vld [vmem:[%s385_s3 + $0x10] sm:$0xff]  ;;  %v70_v14 = vld [vmem:[%s385_s3 + $0x8] sm:$0xff] }
   0x6   :  { %59 = vmatpush.msra.mxu0 %v37_v2  ;;  %v69_v15 = vld [vmem:[%s385_s3] sm:$0xff]  ;;  %v127_v20 = vld [vmem:[%s390_s5 + $0x18] sm:$0xff]  ;;  %v126_v21 = vld [vmem:[%s390_s5 + $0x10] sm:$0xff] }
   0x7   :  { %95 = vmatpush.msra.mxu1 %v74_v6  ;;  %v237_v16 = vld [vmem:[%s386_s2] ss:$0 sm:$0xff]  ;;  %148 = vmatpush.msra.mxu2 %v127_v20  ;;  %v125_v22 = vld [vmem:[%s390_s5 + $0x8] sm:$0xff] }
   0x8   :  { %60 = vmatpush.msra.mxu0 %v36_v5  ;;  %v124_v23 = vld [vmem:[%s390_s5] sm:$0xff]  ;;  %v176_v40 = vld [vmem:[%s392_s7 + $0x8] sm:$0xff] }
   0x9   :  { %96 = vmatpush.msra.mxu1 %v73_v8  ;;  %149 = vmatpush.msra.mxu2 %v126_v21  ;;  %v238_v24 = vld [vmem:[%s388_s4] ss:$0 sm:$0xff] }
   0xa   :  { %61 = vmatpush.msra.mxu0 %v35_v7  ;;  %v175_v41 = vld [vmem:[%s392_s7] sm:$0xff]  ;;  %199 = vmatpush.msra.mxu3 %v176_v40 }
   0xb   :  { %97 = vmatpush.msra.mxu1 %v72_v10  ;;  %150 = vmatpush.msra.mxu2 %v125_v22  ;;  %v239_v42 = vld [vmem:[%s389_s6] ss:$0 sm:$0xff] }
   0xc   :  { %62 = vmatpush.msra.mxu0 %v34_v9  ;;  %200 = vmatpush.msra.mxu3 %v175_v41  ;;  %v240_v58 = vld [vmem:[%s391_s8] ss:$0 sm:$0xff] }
   0xd   :  { %98 = vmatpush.msra.mxu1 %v71_v13  ;;  %151 = vmatpush.msra.mxu2 %v124_v23 }
   0xe   :  { %63 = vmatpush.msra.mxu0 %v33_v11 }
   0xf   :  { %230 = vmatmul.msk.f32.vlgmr.msra.gmra.mxu0 %vm44_vm0, %v32_v12  ;;  %99 = vmatpush.msra.mxu1 %v70_v14 }
  0x11   :  { %100 = vmatpush.msra.mxu1 %v69_v15 }
  0x8c   :  { %v65_v17 = vpop.f32.mrf.mxu0 }
  0x8d   :  { %v66_v18 = vadd.f32 %v237_v16, %v65_v17 }
  0x8f   :  { %v68_v19 = vmax.f32 %v66_v18, 0.0 }
  0x91   :  { %231 = vmatmul.msk.f32.vlgmr.msra.gmra.mxu1 %vm81_vm1, %v68_v19 }
 0x10e   :  { %v102_v25 = vpop.f32.mrf.mxu1 }
 0x10f   :  { %v103_v26 = vadd.f32 %v238_v24, %v102_v25 }
 0x111   :  { %v232_v27 = vmul.f32 -1.442695, %v103_v26 }
 0x113   :  { %241 = vpow2.f32 %v232_v27 }
 0x119   :  { %v242_v28 = vpop.eup %241 }
 0x11a   :  { %v108_v29 = vadd.f32 1.0, %v242_v28 }
 0x11c   :  { %243 = vrcp.f32 %v108_v29  ;;  %v120_v33 = vand.u32 2147483648, %v108_v29  ;;  %v118_v35 = vand.u32 2147483647, %v108_v29  ;;  %vm114_vm3 = vweird.f32 %v108_v29 }
 0x11e   :  { %v121_v37 = vor.u32 1.1754944e-38, %v120_v33  ;;  %vm119_vm6 = vcmp.eq.f32.partialorder %v118_v35, 8.507059e+37 }
 0x122   :  { %v244_v30 = vpop.eup %243 }
 0x123   :  { %v110_v31 = vmul.f32 %v244_v30, %v108_v29  ;;  %vm115_vm2 = vweird.f32 %v244_v30 }
 0x124   :  { %vm116_vm4 = vmor %vm114_vm3, %vm115_vm2 }
 0x125   :  { %v111_v32 = vsub.f32 1.0, %v110_v31 }
 0x127   :  { %v112_v34 = vmul.f32 %v244_v30, %v111_v32 }
 0x129   :  { %v113_v36 = vadd.f32 %v244_v30, %v112_v34 }
 0x12b   :  { %v117_v38 = vsel %vm116_vm4, %v244_v30, %v113_v36 }
 0x12c   :  { %v122_v39 = vsel %vm119_vm6, %v121_v37, %v117_v38 }
 0x12d   :  { %233 = vmatmul.msk.f32.vlgmr.msra.gmra.mxu2 %vm132_vm5, %v122_v39 }
 0x1b0   :  { %v153_v43 = vpop.f32.mrf.mxu2 }
 0x1b1   :  { %v154_v44 = vadd.f32 %v239_v42, %v153_v43 }
 0x1b3   :  { %v234_v45 = vmul.f32 -1.442695, %v154_v44 }
 0x1b5   :  { %245 = vpow2.f32 %v234_v45 }
 0x1bb   :  { %v246_v46 = vpop.eup %245 }
 0x1bc   :  { %v159_v47 = vadd.f32 1.0, %v246_v46 }
 0x1be   :  { %247 = vrcp.f32 %v159_v47  ;;  %v171_v51 = vand.u32 2147483648, %v159_v47  ;;  %v169_v53 = vand.u32 2147483647, %v159_v47  ;;  %vm165_vm8 = vweird.f32 %v159_v47 }
 0x1c0   :  { %v172_v55 = vor.u32 1.1754944e-38, %v171_v51  ;;  %vm170_vm11 = vcmp.eq.f32.partialorder %v169_v53, 8.507059e+37 }
 0x1c4   :  { %v248_v48 = vpop.eup %247 }
 0x1c5   :  { %v161_v49 = vmul.f32 %v248_v48, %v159_v47  ;;  %vm166_vm7 = vweird.f32 %v248_v48 }
 0x1c6   :  { %vm167_vm9 = vmor %vm165_vm8, %vm166_vm7 }
 0x1c7   :  { %v162_v50 = vsub.f32 1.0, %v161_v49 }
 0x1c9   :  { %v163_v52 = vmul.f32 %v248_v48, %v162_v50 }
 0x1cb   :  { %v164_v54 = vadd.f32 %v248_v48, %v163_v52 }
 0x1cd   :  { %v168_v56 = vsel %vm167_vm9, %v248_v48, %v164_v54 }
 0x1ce   :  { %v173_v57 = vsel %vm170_vm11, %v172_v55, %v168_v56 }
 0x1cf   :  { %235 = vmatmul.msk.f32.vlgmr.msra.gmra.mxu3 %vm181_vm10, %v173_v57 }
 0x252   :  { %v202_v59 = vpop.f32.mrf.mxu3 }
 0x253   :  { %v203_v60 = vadd.f32 %v240_v58, %v202_v59 }
 0x255   :  { %v236_v61 = vmul.f32 -1.442695, %v203_v60 }
 0x257   :  { %249 = vpow2.f32 %v236_v61 }
 0x25d   :  { %v250_v62 = vpop.eup %249 }
 0x25e   :  { %v208_v63 = vadd.f32 1.0, %v250_v62 }
 0x260   :  { %251 = vrcp.f32 %v208_v63  ;;  %v220_v3 = vand.u32 2147483648, %v208_v63  ;;  %v218_v5 = vand.u32 2147483647, %v208_v63  ;;  %vm214_vm13 = vweird.f32 %v208_v63 }
 0x262   :  { %v221_v7 = vor.u32 1.1754944e-38, %v220_v3  ;;  %vm219_vm0 = vcmp.eq.f32.partialorder %v218_v5, 8.507059e+37 }
 0x266   :  { %v252_v0 = vpop.eup %251 }
 0x267   :  { %v210_v1 = vmul.f32 %v252_v0, %v208_v63  ;;  %vm215_vm12 = vweird.f32 %v252_v0 }
 0x268   :  { %vm216_vm14 = vmor %vm214_vm13, %vm215_vm12 }
 0x269   :  { %v211_v2 = vsub.f32 1.0, %v210_v1 }
 0x26b   :  { %v212_v4 = vmul.f32 %v252_v0, %v211_v2 }
 0x26d   :  { %v213_v6 = vadd.f32 %v252_v0, %v212_v4 }
 0x26f   :  { %v217_v8 = vsel %vm216_vm14, %v252_v0, %v213_v6 }
 0x270   :  { %v222_v9 = vsel %vm219_vm0, %v221_v7, %v217_v8 }
 0x271   :  { %225 = vst.msk [vmem:[%s393_s9] sm:$0xff] %vm224_vm15, %v222_v9 }

</bundles_post_ra>
